<compile_context>
chip_gen: v6e
topology: v6e:2x2x1
jax: 0.10.0
libtpu: 0.0.40
codegen_flags: <defaults>
</compile_context>

<pallas_src>
import jax
import jax.numpy as jnp
from jax.experimental import pallas as pl
from jax.experimental.pallas import tpu as pltpu

NEG_SLOPE = 0.01  # PyTorch nn.LeakyReLU default


def _round_up(n, m):
    return ((n + m - 1) // m) * m


def _leaky_relu(x):
    return jnp.where(x > 0, x, NEG_SLOPE * x)


def dqn_mlp_kernel(x_ref,
                   w1_ref, b1_ref,
                   w2_ref, b2_ref,
                   w3_ref, b3_ref,
                   w4_ref, b4_ref,
                   o_ref):
    """Fused 4-layer MLP forward for one batch tile.

    x_ref : (bt, state_size)      VMEM, f32
    wN    : (in, out) [padded]    VMEM, bf16 (resident, constant index map)
    bN    : (1, out)  [padded]    VMEM, f32
    o_ref : (bt, out_pad)         VMEM, f32 (lane-dense, 128-padded)
    """
    wdt = w1_ref.dtype  # bf16: native MXU input path on v5e/v6e/v7x

    # Layer 1: state_size -> 256
    h = jnp.dot(x_ref[...].astype(wdt), w1_ref[...],
                preferred_element_type=jnp.float32) + b1_ref[...]
    h = _leaky_relu(h).astype(wdt)  # LeakyReLU in f32 (no bf16 VPU on v5e)

    # Layer 2: 256 -> 128
    h = jnp.dot(h, w2_ref[...], preferred_element_type=jnp.float32) + b2_ref[...]
    h = _leaky_relu(h).astype(wdt)

    # Layer 3: 128 -> 128 (64 real + 64 zero-padded lanes)
    h = jnp.dot(h, w3_ref[...], preferred_element_type=jnp.float32) + b3_ref[...]
    h = _leaky_relu(h).astype(wdt)

    # Layer 4: 128 -> out_pad (action_size real + zero-padded lanes)
    q = jnp.dot(h, w4_ref[...], preferred_element_type=jnp.float32) + b4_ref[...]
    o_ref[...] = q.astype(o_ref.dtype)


def pack_params(params, *, param_dtype=jnp.bfloat16):
    """Zero-pad layers 3/4 to lane-dense (multiple-of-128) widths and cast
    weights to bf16. Padding with zeros is numerically identical since padded
    weight/bias entries contribute nothing and padded outputs are sliced off.
    """
    w3, b3 = params["w3"], params["b3"]
    w4, b4 = params["w4"], params["b4"]
    h3 = w3.shape[1]
    action_size = w4.shape[1]
    h3_pad = _round_up(h3, 128)
    out_pad = _round_up(action_size, 128)

    w3p = jnp.pad(w3, ((0, 0), (0, h3_pad - h3)))
    b3p = jnp.pad(b3, ((0, 0), (0, h3_pad - h3)))
    w4p = jnp.pad(w4, ((0, h3_pad - h3), (0, out_pad - action_size)))
    b4p = jnp.pad(b4, ((0, 0), (0, out_pad - action_size)))

    return {
        "w1": params["w1"].astype(param_dtype),
        "b1": params["b1"].astype(jnp.float32),
        "w2": params["w2"].astype(param_dtype),
        "b2": params["b2"].astype(jnp.float32),
        "w3": w3p.astype(param_dtype),
        "b3": b3p.astype(jnp.float32),
        "w4": w4p.astype(param_dtype),
        "b4": b4p.astype(jnp.float32),
        "action_size": action_size,
    }


def dqn_forward(x, packed, *, batch_tile=128):
    """Run the DeepQNetwork forward pass via the fused Pallas kernel.

    x      : (B, state_size) float32
    packed : dict from pack_params() (bf16 weights, 128-padded layers 3/4)
    returns: (B, action_size) float32
    """
    B, state_size = x.shape
    action_size = packed["action_size"]
    w1, b1 = packed["w1"], packed["b1"]
    w2, b2 = packed["w2"], packed["b2"]
    w3, b3 = packed["w3"], packed["b3"]
    w4, b4 = packed["w4"], packed["b4"]
    out_pad = w4.shape[1]

    # Effective batch tile:
    #  - multiple of 8 (f32 sublane), capped at the rounded-up batch so small
    #    batches are not grossly over-padded;
    #  - keep >= 2 grid steps when possible so v7x's 2 TensorCores both get a
    #    "parallel" slice of the batch (near-zero effect on 1-TC v5e/v6e).
    bt = max(8, min(batch_tile, _round_up(B, 8)))
    if B > 8 and pl.cdiv(B, bt) < 2:
        bt = max(8, min(bt, _round_up(pl.cdiv(B, 2), 8)))
    num_tiles = pl.cdiv(B, bt)
    b_pad = num_tiles * bt
    if b_pad != B:
        x = jnp.pad(x, ((0, b_pad - B), (0, 0)))

    def x_map(i):
        return (i, 0)

    def full_map(i):
        return (0, 0)

    in_specs = [pl.BlockSpec((bt, state_size), x_map)]
    for w, b in ((w1, b1), (w2, b2), (w3, b3), (w4, b4)):
        in_specs.append(pl.BlockSpec(w.shape, full_map))
        in_specs.append(pl.BlockSpec(b.shape, full_map))
    out_spec = pl.BlockSpec((bt, out_pad), x_map)

    # Advisory cost hint so XLA schedules/overlaps this small custom call.
    flops = 2 * b_pad * sum(int(w.shape[0]) * int(w.shape[1])
                            for w in (w1, w2, w3, w4))
    bytes_accessed = int(x.nbytes) + b_pad * out_pad * 4 + sum(
        int(a.nbytes) for a in (w1, b1, w2, b2, w3, b3, w4, b4))
    cost = pl.CostEstimate(flops=int(flops), transcendentals=0,
                           bytes_accessed=int(bytes_accessed))

    kernel = pl.pallas_call(
        dqn_mlp_kernel,
        out_shape=jax.ShapeDtypeStruct((b_pad, out_pad), jnp.float32),
        grid_spec=pltpu.PrefetchScalarGridSpec(
            num_scalar_prefetch=0,
            grid=(num_tiles,),
            in_specs=in_specs,
            out_specs=out_spec,
        ),
        compiler_params=pltpu.CompilerParams(
            dimension_semantics=("parallel",)),
        cost_estimate=cost,
    )

    out = kernel(x, w1, b1, w2, b2, w3, b3, w4, b4)
    return out[:B, :action_size]


def init_params(key, state_size, action_size):
    """Deterministic PyTorch-style (uniform +/- 1/sqrt(fan_in)) init.
    Weights are stored [in_features, out_features] (transpose of nn.Linear)."""
    dims = [(state_size, 256), (256, 128), (128, 64), (64, action_size)]
    params = {}
    for idx, (fan_in, fan_out) in enumerate(dims, start=1):
        key, kw, kb = jax.random.split(key, 3)
        bound = 1.0 / jnp.sqrt(float(fan_in))
        params[f"w{idx}"] = jax.random.uniform(
            kw, (fan_in, fan_out), jnp.float32, -bound, bound)
        params[f"b{idx}"] = jax.random.uniform(
            kb, (1, fan_out), jnp.float32, -bound, bound)
    return params


def dqn_forward_ref(x, params, param_dtype=jnp.float32):
    """Plain-JAX reference. With param_dtype=bfloat16 it mirrors the kernel's
    numerics (bf16 operands, f32 accumulation, f32 LeakyReLU)."""
    h = x
    for idx in (1, 2, 3):
        w = params[f"w{idx}"].astype(param_dtype)
        h = jnp.dot(h.astype(param_dtype), w,
                    preferred_element_type=jnp.float32) + params[f"b{idx}"]
        h = _leaky_relu(h)
    w4 = params["w4"].astype(param_dtype)
    return jnp.dot(h.astype(param_dtype), w4,
                   preferred_element_type=jnp.float32) + params["b4"]


if __name__ == "__main__":
    state_size = 16
    action_size = 8

    key = jax.random.PRNGKey(0)
    key, kx = jax.random.split(key)
    params = init_params(key, state_size, action_size)
    packed = pack_params(params)

    # Small batch (single tile, exercises batch-tile capping).
    x = jax.random.normal(kx, (8, state_size), jnp.float32)
    out = jax.block_until_ready(dqn_forward(x, packed))
    assert out.shape == (8, action_size)
    ref_bf16 = dqn_forward_ref(x, params, jnp.bfloat16)
    ref_f32 = dqn_forward_ref(x, params, jnp.float32)
    assert jnp.allclose(out, ref_bf16, atol=5e-3, rtol=5e-3), "mismatch vs bf16 ref"
    assert jnp.allclose(out, ref_f32, atol=3e-2, rtol=3e-2), "mismatch vs f32 ref"

    # Batch that exercises batch padding + a multi-step "parallel" grid.
    key, kx2 = jax.random.split(key)
    x2 = jax.random.normal(kx2, (200, state_size), jnp.float32)
    out2 = jax.block_until_ready(dqn_forward(x2, packed))
    assert out2.shape == (200, action_size)
    ref2 = dqn_forward_ref(x2, params, jnp.bfloat16)
    assert jnp.allclose(out2, ref2, atol=5e-3, rtol=5e-3), "mismatch vs bf16 ref (padded batch)"

    print("KERNEL_OK")
</pallas_src>

<mosaic_0001>
module attributes {stable_mosaic.version = 11 : i64} {
  func.func @dqn_mlp_kernel(%arg0: i32, %arg1: memref<8x16xf32, #tpu.memory_space<vmem>>, %arg2: memref<16x256xbf16, #tpu.memory_space<vmem>>, %arg3: memref<1x256xf32, #tpu.memory_space<vmem>>, %arg4: memref<256x128xbf16, #tpu.memory_space<vmem>>, %arg5: memref<1x128xf32, #tpu.memory_space<vmem>>, %arg6: memref<128x128xbf16, #tpu.memory_space<vmem>>, %arg7: memref<1x128xf32, #tpu.memory_space<vmem>>, %arg8: memref<128x128xbf16, #tpu.memory_space<vmem>>, %arg9: memref<1x128xf32, #tpu.memory_space<vmem>>, %arg10: memref<8x128xf32, #tpu.memory_space<vmem>>) attributes {dimension_semantics = [#tpu.dimension_semantics<parallel>], iteration_bounds = array<i64: 1>, scalar_prefetch = 0 : i64, scratch_operands = 0 : i64, tpu.core_type = #tpu.core_type<tc>, window_params = [{transform_indices = @transform_0, window_bounds = array<i64: 8, 16>}, {pipeline_mode = #tpu.pipeline_mode<synchronous>, transform_indices = @transform_1, window_bounds = array<i64: 16, 256>}, {pipeline_mode = #tpu.pipeline_mode<synchronous>, transform_indices = @transform_2, window_bounds = array<i64: 1, 256>}, {pipeline_mode = #tpu.pipeline_mode<synchronous>, transform_indices = @transform_3, window_bounds = array<i64: 256, 128>}, {pipeline_mode = #tpu.pipeline_mode<synchronous>, transform_indices = @transform_4, window_bounds = array<i64: 1, 128>}, {pipeline_mode = #tpu.pipeline_mode<synchronous>, transform_indices = @transform_5, window_bounds = array<i64: 128, 128>}, {pipeline_mode = #tpu.pipeline_mode<synchronous>, transform_indices = @transform_6, window_bounds = array<i64: 1, 128>}, {pipeline_mode = #tpu.pipeline_mode<synchronous>, transform_indices = @transform_7, window_bounds = array<i64: 128, 128>}, {pipeline_mode = #tpu.pipeline_mode<synchronous>, transform_indices = @transform_8, window_bounds = array<i64: 1, 128>}, {transform_indices = @transform_9, window_bounds = array<i64: 8, 128>}]} {
    %c0 = arith.constant 0 : index
    %c0_0 = arith.constant 0 : index
    %0 = vector.load %arg1[%c0, %c0_0] : memref<8x16xf32, #tpu.memory_space<vmem>>, vector<8x16xf32>
    %1 = arith.truncf %0 : vector<8x16xf32> to vector<8x16xbf16>
    %c0_1 = arith.constant 0 : index
    %c0_2 = arith.constant 0 : index
    %2 = vector.load %arg2[%c0_1, %c0_2] : memref<16x256xbf16, #tpu.memory_space<vmem>>, vector<16x256xbf16>
    %cst = arith.constant dense<0.000000e+00> : vector<8x256xf32>
    %3 = tpu.matmul %1, %2, %cst {dimension_numbers = #tpu.dot_dimension_numbers<[1], [0], [0], [1], [0, 0, 1, 1], [], []>} : vector<8x16xbf16>, vector<16x256xbf16>, vector<8x256xf32> -> vector<8x256xf32>
    %c0_3 = arith.constant 0 : index
    %c0_4 = arith.constant 0 : index
    %4 = vector.load %arg3[%c0_3, %c0_4] : memref<1x256xf32, #tpu.memory_space<vmem>>, vector<1x256xf32>
    %5 = vector.broadcast %4 : vector<1x256xf32> to vector<8x256xf32>
    %6 = arith.addf %3, %5 : vector<8x256xf32>
    %cst_5 = arith.constant 0.000000e+00 : f32
    %7 = vector.broadcast %cst_5 : f32 to vector<8x256xf32>
    %8 = arith.cmpf ogt, %6, %7 : vector<8x256xf32>
    %cst_6 = arith.constant 0.00999999977 : f32
    %9 = vector.broadcast %cst_6 : f32 to vector<8x256xf32>
    %10 = arith.mulf %9, %6 : vector<8x256xf32>
    %11 = arith.select %8, %6, %10 : vector<8x256xi1>, vector<8x256xf32>
    %12 = arith.truncf %11 : vector<8x256xf32> to vector<8x256xbf16>
    %c0_7 = arith.constant 0 : index
    %c0_8 = arith.constant 0 : index
    %13 = vector.load %arg4[%c0_7, %c0_8] : memref<256x128xbf16, #tpu.memory_space<vmem>>, vector<256x128xbf16>
    %cst_9 = arith.constant dense<0.000000e+00> : vector<8x128xf32>
    %14 = tpu.matmul %12, %13, %cst_9 {dimension_numbers = #tpu.dot_dimension_numbers<[1], [0], [0], [1], [0, 0, 1, 1], [], []>} : vector<8x256xbf16>, vector<256x128xbf16>, vector<8x128xf32> -> vector<8x128xf32>
    %c0_10 = arith.constant 0 : index
    %c0_11 = arith.constant 0 : index
    %15 = vector.load %arg5[%c0_10, %c0_11] : memref<1x128xf32, #tpu.memory_space<vmem>>, vector<1x128xf32>
    %16 = vector.broadcast %15 : vector<1x128xf32> to vector<8x128xf32>
    %17 = arith.addf %14, %16 : vector<8x128xf32>
    %cst_12 = arith.constant 0.000000e+00 : f32
    %18 = vector.broadcast %cst_12 : f32 to vector<8x128xf32>
    %19 = arith.cmpf ogt, %17, %18 : vector<8x128xf32>
    %cst_13 = arith.constant 0.00999999977 : f32
    %20 = vector.broadcast %cst_13 : f32 to vector<8x128xf32>
    %21 = arith.mulf %20, %17 : vector<8x128xf32>
    %22 = arith.select %19, %17, %21 : vector<8x128xi1>, vector<8x128xf32>
    %23 = arith.truncf %22 : vector<8x128xf32> to vector<8x128xbf16>
    %c0_14 = arith.constant 0 : index
    %c0_15 = arith.constant 0 : index
    %24 = vector.load %arg6[%c0_14, %c0_15] : memref<128x128xbf16, #tpu.memory_space<vmem>>, vector<128x128xbf16>
    %cst_16 = arith.constant dense<0.000000e+00> : vector<8x128xf32>
    %25 = tpu.matmul %23, %24, %cst_16 {dimension_numbers = #tpu.dot_dimension_numbers<[1], [0], [0], [1], [0, 0, 1, 1], [], []>} : vector<8x128xbf16>, vector<128x128xbf16>, vector<8x128xf32> -> vector<8x128xf32>
    %c0_17 = arith.constant 0 : index
    %c0_18 = arith.constant 0 : index
    %26 = vector.load %arg7[%c0_17, %c0_18] : memref<1x128xf32, #tpu.memory_space<vmem>>, vector<1x128xf32>
    %27 = vector.broadcast %26 : vector<1x128xf32> to vector<8x128xf32>
    %28 = arith.addf %25, %27 : vector<8x128xf32>
    %cst_19 = arith.constant 0.000000e+00 : f32
    %29 = vector.broadcast %cst_19 : f32 to vector<8x128xf32>
    %30 = arith.cmpf ogt, %28, %29 : vector<8x128xf32>
    %cst_20 = arith.constant 0.00999999977 : f32
    %31 = vector.broadcast %cst_20 : f32 to vector<8x128xf32>
    %32 = arith.mulf %31, %28 : vector<8x128xf32>
    %33 = arith.select %30, %28, %32 : vector<8x128xi1>, vector<8x128xf32>
    %34 = arith.truncf %33 : vector<8x128xf32> to vector<8x128xbf16>
    %c0_21 = arith.constant 0 : index
    %c0_22 = arith.constant 0 : index
    %35 = vector.load %arg8[%c0_21, %c0_22] : memref<128x128xbf16, #tpu.memory_space<vmem>>, vector<128x128xbf16>
    %cst_23 = arith.constant dense<0.000000e+00> : vector<8x128xf32>
    %36 = tpu.matmul %34, %35, %cst_23 {dimension_numbers = #tpu.dot_dimension_numbers<[1], [0], [0], [1], [0, 0, 1, 1], [], []>} : vector<8x128xbf16>, vector<128x128xbf16>, vector<8x128xf32> -> vector<8x128xf32>
    %c0_24 = arith.constant 0 : index
    %c0_25 = arith.constant 0 : index
    %37 = vector.load %arg9[%c0_24, %c0_25] : memref<1x128xf32, #tpu.memory_space<vmem>>, vector<1x128xf32>
    %38 = vector.broadcast %37 : vector<1x128xf32> to vector<8x128xf32>
    %39 = arith.addf %36, %38 : vector<8x128xf32>
    %c0_26 = arith.constant 0 : index
    %c0_27 = arith.constant 0 : index
    %40 = vector.load %arg10[%c0_26, %c0_27] : memref<8x128xf32, #tpu.memory_space<vmem>>, vector<8x128xf32>
    tpu.vector_store %arg10[%c0_26, %c0_27], %39 {strides = array<i32>} : memref<8x128xf32, #tpu.memory_space<vmem>>, vector<8x128xf32>,
    return
  }
  func.func @transform_0(%arg0: i32) -> (i32, i32) {
    %c0_i32 = arith.constant 0 : i32
    %c0_i32_0 = arith.constant 0 : i32
    return %arg0, %c0_i32 : i32, i32
  }
  func.func @transform_1(%arg0: i32) -> (i32, i32) {
    %c0_i32 = arith.constant 0 : i32
    %c0_i32_0 = arith.constant 0 : i32
    %c0_i32_1 = arith.constant 0 : i32
    return %c0_i32, %c0_i32_0 : i32, i32
  }
  func.func @transform_2(%arg0: i32) -> (i32, i32) {
    %c0_i32 = arith.constant 0 : i32
    %c0_i32_0 = arith.constant 0 : i32
    %c0_i32_1 = arith.constant 0 : i32
    return %c0_i32, %c0_i32_0 : i32, i32
  }
  func.func @transform_3(%arg0: i32) -> (i32, i32) {
    %c0_i32 = arith.constant 0 : i32
    %c0_i32_0 = arith.constant 0 : i32
    %c0_i32_1 = arith.constant 0 : i32
    return %c0_i32, %c0_i32_0 : i32, i32
  }
  func.func @transform_4(%arg0: i32) -> (i32, i32) {
    %c0_i32 = arith.constant 0 : i32
    %c0_i32_0 = arith.constant 0 : i32
    %c0_i32_1 = arith.constant 0 : i32
    return %c0_i32, %c0_i32_0 : i32, i32
  }
  func.func @transform_5(%arg0: i32) -> (i32, i32) {
    %c0_i32 = arith.constant 0 : i32
    %c0_i32_0 = arith.constant 0 : i32
    %c0_i32_1 = arith.constant 0 : i32
    return %c0_i32, %c0_i32_0 : i32, i32
  }
  func.func @transform_6(%arg0: i32) -> (i32, i32) {
    %c0_i32 = arith.constant 0 : i32
    %c0_i32_0 = arith.constant 0 : i32
    %c0_i32_1 = arith.constant 0 : i32
    return %c0_i32, %c0_i32_0 : i32, i32
  }
  func.func @transform_7(%arg0: i32) -> (i32, i32) {
    %c0_i32 = arith.constant 0 : i32
    %c0_i32_0 = arith.constant 0 : i32
    %c0_i32_1 = arith.constant 0 : i32
    return %c0_i32, %c0_i32_0 : i32, i32
  }
  func.func @transform_8(%arg0: i32) -> (i32, i32) {
    %c0_i32 = arith.constant 0 : i32
    %c0_i32_0 = arith.constant 0 : i32
    %c0_i32_1 = arith.constant 0 : i32
    return %c0_i32, %c0_i32_0 : i32, i32
  }
  func.func @transform_9(%arg0: i32) -> (i32, i32) {
    %c0_i32 = arith.constant 0 : i32
    %c0_i32_0 = arith.constant 0 : i32
    return %arg0, %c0_i32 : i32, i32
  }
}

</mosaic_0001>

<bundles_post_ra>
// kernel: tpu_custom_call.1
= control target key start
LH: loop header
LB: loop body
LE: loop exit
PB: predicated region body
PF: predicated region fallthrough
CT: control target
= control target key end

     0   :  { %14 = vsyncpa [#allocation3], 0  ;;  %s1016_s0 = inlined_call_operand.hbm [shape: f32[8,16], index: 0, kind: input, shape index: {}]   ;;  %s1017_s1 = inlined_call_operand.hbm [shape: bf16[16,256], index: 1, kind: input, shape index: {}]   ;;  %s1018_s2 = inlined_call_operand.vmem [shape: f32[1,256], index: 2, kind: input, shape index: {}]   ;;  %s1019_s3 = inlined_call_operand.hbm [shape: bf16[256,128], index: 3, kind: input, shape index: {}]   ;;  %s1020_s4 = inlined_call_operand.vmem [shape: f32[1,128], index: 4, kind: input, shape index: {}]   ;;  %s1021_s5 = inlined_call_operand.hbm [shape: bf16[128,128], index: 5, kind: input, shape index: {}]   ;;  %s1022_s6 = inlined_call_operand.vmem [shape: f32[1,128], index: 6, kind: input, shape index: {}]   ;;  %s1023_s7 = inlined_call_operand.hbm [shape: bf16[128,128], index: 7, kind: input, shape index: {}]   ;;  %s1024_s8 = inlined_call_operand.vmem [shape: f32[1,128], index: 8, kind: input, shape index: {}]   ;;  %s1025_s9 = inlined_call_operand.hbm [shape: f32[8,128], index: 9, kind: output, shape index: {}]  }
   0x1   :  { %15 = vsyncpa [#allocation6], 0 }
   0x2   :  { %16 = vsyncpa [#allocation9], 0 }
   0x3   :  { %17 = vsyncpa [#allocation4], 0  ;;  %s896_s30 = smov [#allocation5]  }
   0x4   :  { %s33_s10 = sshll.u32 %s896_s30, 4  ;;  %s34_s10 = int_to_ptr.vmem [resolvable:$true] %s33_s10 }
   0x5   :  { %s776_s11 = scalar_lea.vmem %s34_s10, 256  ;;  %p781_p1 = scmp.lt.s32.totalorder %s34_s10, %s34_s10 }
   0x6   :  { %p777_p0 = scmp.ne.s32.totalorder %s34_s10, %s776_s11  ;;  %p782_p2 = scmp.lt.s32.totalorder %s776_s11, %s776_s11 }
   0x8   :  { %p783_p3 = por %p782_p2, %p781_p1 }
   0xa   :  { %p784_p4 = pnand %p783_p3, %p777_p0 }
   0xc   :  { %787 = shalt.err (!%p784_p4)
}
   0xd   :  { %s897_s12 = smov 128   ;;  %s898_s13 = smov 8  }
   0xe   :  { %39 = dma.hbm_to_vmem [thread:$0]  %s1017_s1, 256, %s34_s10, [#allocation6], %s897_s12, %s897_s12, %s898_s13  }
   0xf   :  { %s899_s16 = smov [#allocation8]   ;;  %s900_s18 = smov [#allocation2]  }
  0x10   :  { %s61_s17 = sshll.u32 %s899_s16, 4  ;;  %s24_s19 = sshll.u32 %s900_s18, 4  ;;  %s62_s17 = int_to_ptr.vmem [resolvable:$true] %s61_s17  ;;  %s25_s19 = int_to_ptr.vmem [resolvable:$true] %s24_s19 }
  0x11   :  { %s796_s20 = scalar_lea.vmem %s62_s17, 1024  ;;  %p801_p6 = scmp.lt.s32.totalorder %s62_s17, %s62_s17 }
  0x12   :  { %p797_p5 = scmp.ne.s32.totalorder %s62_s17, %s796_s20  ;;  %p802_p7 = scmp.lt.s32.totalorder %s796_s20, %s796_s20 }
  0x14   :  { %p803_p8 = por %p802_p7, %p801_p6 }
  0x16   :  { %p804_p9 = pnand %p803_p8, %p797_p5 }
  0x18   :  { %807 = shalt.err (!%p804_p9)
}
  0x19   :  { %s901_s21 = smov 64   ;;  %s902_s22 = smov 4  }
  0x1a   :  { %67 = dma.hbm_to_vmem [thread:$0]  %s1021_s5, 1024, %s62_s17, [#allocation9], %s901_s21, %s901_s21, %s902_s22  }
  0x1b   :  { %s816_s1 = scalar_lea.vmem %s25_s19, 128  ;;  %p821_p11 = scmp.lt.s32.totalorder %s25_s19, %s25_s19 }
  0x1c   :  { %p817_p10 = scmp.ne.s32.totalorder %s25_s19, %s816_s1  ;;  %p822_p12 = scmp.lt.s32.totalorder %s816_s1, %s816_s1 }
  0x1e   :  { %p823_p13 = por %p822_p12, %p821_p11 }
  0x20   :  { %p824_p0 = pnand %p823_p13, %p817_p10 }
  0x22   :  { %827 = shalt.err (!%p824_p0)
}
  0x23   :  { %27 = dma.hbm_to_vmem [thread:$0]  %s1016_s0, 128, %s25_s19, [#allocation3]  }
  0x24   :  { %s903_s27 = smov [#allocation7]   ;;  %s904_s29 = smov [#allocation10]  }
  0x25   :  { %s47_s28 = sshll.u32 %s903_s27, 4  ;;  %s75_s30 = sshll.u32 %s904_s29, 4  ;;  %s48_s28 = int_to_ptr.vmem [resolvable:$true] %s47_s28  ;;  %s76_s30 = int_to_ptr.vmem [resolvable:$true] %s75_s30 }
  0x26   :  { %s836_s10 = scalar_lea.vmem %s48_s28, 2048  ;;  %p841_p2 = scmp.lt.s32.totalorder %s48_s28, %s48_s28 }
  0x27   :  { %p837_p1 = scmp.ne.s32.totalorder %s48_s28, %s836_s10  ;;  %p842_p3 = scmp.lt.s32.totalorder %s836_s10, %s836_s10 }
  0x29   :  { %p843_p4 = por %p842_p3, %p841_p2 }
  0x2b   :  { %p844_p5 = pnand %p843_p4, %p837_p1 }
  0x2d   :  { %847 = shalt.err (!%p844_p5)
}
  0x2e   :  { %53 = dma.hbm_to_vmem [thread:$0]  %s1019_s3, 2048, %s48_s28, [#allocation6], %s901_s21, %s901_s21, %s902_s22  }
  0x2f   :  { %s856_s0 = scalar_lea.vmem %s76_s30, 1024  ;;  %p861_p7 = scmp.lt.s32.totalorder %s76_s30, %s76_s30 }
  0x30   :  { %p857_p6 = scmp.ne.s32.totalorder %s76_s30, %s856_s0  ;;  %p862_p8 = scmp.lt.s32.totalorder %s856_s0, %s856_s0 }
  0x32   :  { %p863_p9 = por %p862_p8, %p861_p7 }
  0x34   :  { %p864_p10 = pnand %p863_p9, %p857_p6 }
  0x36   :  { %867 = shalt.err (!%p864_p10)
}
  0x37   :  { %81 = dma.hbm_to_vmem [thread:$0]  %s1023_s7, 1024, %s76_s30, [#allocation9], %s901_s21, %s901_s21, %s902_s22  }
  0x38   :  { %888 = dma.done.wait [#allocation3], 128  }
  0x39   :  { %889 = vsyncadd [#allocation3], 4294967168 }
  0x3a   :  { %890 = dma.done.wait [#allocation6], 2304  }
  0x3b   :  { %891 = vsyncadd [#allocation6], 4294964992 }
  0x3c   :  { %892 = dma.done.wait [#allocation9], 2048  }
  0x3d   :  { %893 = vsyncadd [#allocation9], 4294965248  ;;  %v905_v0 = vmov 0   ;;  %v733_v1 = vld [vmem:[#allocation5 + $0x4] ss:$8 sps:$4 sm:$0xff]   ;;  %v100_v3 = vld [vmem:[#allocation2] sm:$0xff]  ;;  %v106_v27 = vlaneseq }
  0x3e   :  { %162 = vmatprep.mubr.bf16.mxu0 %v905_v0  ;;  %v735_v2 = vld [vmem:[#allocation5] ss:$8 sps:$4 sm:$0xff]   ;;  %144 = vmatprep.subr.bf16.mxu0 %v733_v1  ;;  %v101_v4 = vpack.c.bf16 %v100_v3, %v100_v3  ;;  %vm126_vm0 = vcmask 130048   ;;  %v740_v9 = vld [vmem:[#allocation7 + $0x68] sm:$0xff]   ;;  %v742_v11 = vld [vmem:[#allocation7 + $0x60] sm:$0xff]   ;;  %v906_v22 = vmov 0.0  }
  0x3f   :  { %v736_v5 = vld [vmem:[#allocation7 + $0x78] sm:$0xff]   ;;  %145 = vmatpush1.bf16.msra.mxu0 %v735_v2  ;;  %v738_v7 = vld [vmem:[#allocation7 + $0x70] sm:$0xff]   ;;  %v741_v10 = vld [vmem:[#allocation7 + $0x28] sm:$0xff]   ;;  %v107_v28 = vshrl.u32 %v106_v27, 7  ;;  %vm907_vm3 = vmmov 0   ;;  %s908_s18 = smov [#allocation11]  }
  0x40   :  { %v737_v6 = vld [vmem:[#allocation7 + $0x38] sm:$0xff]   ;;  %640 = vmatprep.subr.bf16.mxu1 %v736_v5  ;;  %v739_v8 = vld [vmem:[#allocation7 + $0x30] sm:$0xff]   ;;  %v743_v12 = vld [vmem:[#allocation7 + $0x20] sm:$0xff]   ;;  %680 = vmatprep.subr.bf16.mxu0 %v906_v22  ;;  %s591_s19 = sshll.u32 %s908_s18, 4  ;;  %s592_s19 = int_to_ptr.vmem [resolvable:$true] %s591_s19 }
  0x41   :  { %641 = vmatpush3.bf16.msra.mxu1 %v737_v6  ;;  %v744_v13 = vld [vmem:[#allocation7 + $0x58] sm:$0xff]   ;;  %v746_v15 = vld [vmem:[#allocation7 + $0x50] sm:$0xff]   ;;  %v748_v17 = vld [vmem:[#allocation7 + $0x48] sm:$0xff]   ;;  %v108_v29 = vsub.s32 0, %v107_v28  ;;  %v112_v31 = vsub.s32 1, %v107_v28  ;;  %p873_p12 = scmp.lt.s32.totalorder %s592_s19, %s592_s19 }
  0x42   :  { %604 = vmatmul.mubr.msk.bf16.vlgmr.msra.gmra.mxu0 %vm126_vm0, %v101_v4  ;;  %642 = vmatprep.subr.bf16.mxu1 %v738_v7  ;;  %v745_v14 = vld [vmem:[#allocation7 + $0x18] sm:$0xff]   ;;  %v747_v16 = vld [vmem:[#allocation7 + $0x10] sm:$0xff]   ;;  %v749_v18 = vld [vmem:[#allocation7 + $0x8] sm:$0xff]  }
  0x43   :  { %v750_v19 = vld [vmem:[#allocation7 + $0x40] sm:$0xff]   ;;  %v752_v21 = vld [vmem:[#allocation8 + $0x38] sm:$0xff]   ;;  %v753_v23 = vld [vmem:[#allocation8 + $0x30] sm:$0xff]   ;;  %696 = vmatprep.mubr.msk.bf16.mxu0 %vm907_vm3, %v906_v22 }
  0x44   :  { %v751_v20 = vld [vmem:[#allocation7] sm:$0xff]   ;;  %681 = vmatpush3.bf16.msra.mxu0 %v752_v21  ;;  %v754_v24 = vld [vmem:[#allocation8 + $0x28] sm:$0xff]   ;;  %v756_v26 = vld [vmem:[#allocation8 + $0x18] sm:$0xff]  }
  0x45   :  { %643 = vmatpush3.bf16.msra.mxu1 %v739_v8  ;;  %682 = vmatprep.subr.bf16.mxu0 %v906_v22  ;;  %v755_v25 = vld [vmem:[#allocation8 + $0x20] sm:$0xff]   ;;  %v104_v30 = vld [vmem:[%s1018_s2] sm:$0x3]  ;;  %v757_v46 = vld [vmem:[#allocation8 + $0x10] sm:$0xff]  }
  0x46   :  { %644 = vmatprep.subr.bf16.mxu1 %v740_v9  ;;  %v109_v32 = vrot.slane %v104_v30, %v108_v29  ;;  %v113_v33 = vrot.slane %v104_v30, %v112_v31  ;;  %v758_v47 = vld [vmem:[#allocation8 + $0x8] sm:$0xff]   ;;  %v759_v48 = vld [vmem:[#allocation8] sm:$0xff]   ;;  %v760_v49 = vld [vmem:[#allocation10 + $0x38] sm:$0xff]  }
  0x47   :  { %v761_v50 = vld [vmem:[#allocation10 + $0x30] sm:$0xff]   ;;  %v762_v51 = vld [vmem:[#allocation10 + $0x28] sm:$0xff]   ;;  %v763_v52 = vld [vmem:[#allocation10 + $0x20] sm:$0xff]  }
  0x48   :  { %683 = vmatpush3.bf16.msra.mxu0 %v753_v23  ;;  %v764_v53 = vld [vmem:[#allocation10 + $0x18] sm:$0xff]   ;;  %v765_v54 = vld [vmem:[#allocation10 + $0x10] sm:$0xff]   ;;  %v605_v56 = vld [vmem:[%s1020_s4] ss:$0 sm:$0xff] }
  0x49   :  { %645 = vmatpush3.bf16.msra.mxu1 %v741_v10  ;;  %684 = vmatprep.subr.bf16.mxu0 %v906_v22  ;;  %v766_v1 = vld [vmem:[#allocation10 + $0x8] sm:$0xff]   ;;  %v767_v2 = vld [vmem:[#allocation10] sm:$0xff]  }
  0x4a   :  { %646 = vmatprep.subr.bf16.mxu1 %v742_v11  ;;  %v622_v3 = vld [vmem:[%s1022_s6] ss:$0 sm:$0xff]  ;;  %s868_s6 = scalar_lea.vmem %s592_s19, 128 }
  0x4b   :  { %p869_p11 = scmp.ne.s32.totalorder %s592_s19, %s868_s6  ;;  %p874_p13 = scmp.lt.s32.totalorder %s868_s6, %s868_s6 }
  0x4c   :  { %685 = vmatpush3.bf16.msra.mxu0 %v754_v24 }
  0x4d   :  { %647 = vmatpush3.bf16.msra.mxu1 %v743_v12  ;;  %686 = vmatprep.subr.bf16.mxu0 %v906_v22  ;;  %v631_v12 = vld [vmem:[%s1024_s8] ss:$0 sm:$0xff]  ;;  %p875_p0 = por %p874_p13, %p873_p12 }
  0x4e   :  { %648 = vmatprep.subr.bf16.mxu1 %v744_v13 }
  0x4f   :  { %p876_p1 = pnand %p875_p0, %p869_p11 }
  0x50   :  { %687 = vmatpush3.bf16.msra.mxu0 %v755_v25 }
  0x51   :  { %649 = vmatpush3.bf16.msra.mxu1 %v745_v14  ;;  %688 = vmatprep.subr.bf16.mxu0 %v906_v22 }
  0x52   :  { %650 = vmatprep.subr.bf16.mxu1 %v746_v15 }
  0x54   :  { %689 = vmatpush3.bf16.msra.mxu0 %v756_v26 }
  0x55   :  { %651 = vmatpush3.bf16.msra.mxu1 %v747_v16  ;;  %690 = vmatprep.subr.bf16.mxu0 %v906_v22 }
  0x56   :  { %652 = vmatprep.subr.bf16.mxu1 %v748_v17 }
  0x58   :  { %691 = vmatpush3.bf16.msra.mxu0 %v757_v46 }
  0x59   :  { %653 = vmatpush3.bf16.msra.mxu1 %v749_v18  ;;  %692 = vmatprep.subr.bf16.mxu0 %v906_v22 }
  0x5a   :  { %654 = vmatprep.subr.bf16.mxu1 %v750_v19 }
  0x5c   :  { %693 = vmatpush3.bf16.msra.mxu0 %v758_v47 }
  0x5d   :  { %655 = vmatpush3.bf16.msra.mxu1 %v751_v20  ;;  %694 = vmatprep.subr.bf16.mxu0 %v906_v22 }
  0x5e   :  { %700 = vmatprep.subr.bf16.mxu1 %v906_v22 }
  0x60   :  { %695 = vmatpush3.bf16.msra.mxu0 %v759_v48 }
 0x102   :  { %v164_v34 = vpop.f32.mrf.mxu0 }
 0x103   :  { %v165_v35 = vadd.f32 %v164_v34, %v109_v32 }
 0x104   :  { %v166_v36 = vpop.f32.mrf.mxu0 }
 0x105   :  { %vm171_vm1 = vcmp.gt.f32.partialorder %v165_v35, 0.0  ;;  %v173_v37 = vmul.f32 0.01, %v165_v35  ;;  %v167_v38 = vadd.f32 %v166_v36, %v113_v33 }
 0x106   :  { %v168_v39 = vpop.f32.mrf.mxu0 }
 0x107   :  { %vm172_vm2 = vcmp.gt.f32.partialorder %v167_v38, 0.0  ;;  %v174_v40 = vmul.f32 0.01, %v167_v38  ;;  %v175_v42 = vsel %vm171_vm1, %v165_v35, %v173_v37 }
 0x108   :  { %v169_v41 = vpop.f32.mrf.mxu0  ;;  %v177_v45 = vpack.c.bf16 %v175_v42, %v175_v42 }
 0x109   :  { %v176_v43 = vsel %vm172_vm2, %v167_v38, %v174_v40 }
 0x10a   :  { %v178_v44 = vpack.c.bf16 %v176_v43, %v176_v43 }
 0x10c   :  { %346 = vmatprep.mubr.bf16.mxu1 %v178_v44 }
 0x10d   :  { %347 = vmatmul.mubr.bf16.vlgmr.msra.gmra.mxu1 %v177_v45 }
 0x10e   :  { %716 = vmatprep.mubr.msk.bf16.mxu1 %vm907_vm3, %v906_v22  ;;  %701 = vmatpush3.bf16.msra.mxu1 %v760_v49 }
 0x10f   :  { %702 = vmatprep.subr.bf16.mxu1 %v906_v22 }
 0x112   :  { %703 = vmatpush3.bf16.msra.mxu1 %v761_v50 }
 0x113   :  { %704 = vmatprep.subr.bf16.mxu1 %v906_v22 }
 0x116   :  { %705 = vmatpush3.bf16.msra.mxu1 %v762_v51 }
 0x117   :  { %706 = vmatprep.subr.bf16.mxu1 %v906_v22 }
 0x11a   :  { %707 = vmatpush3.bf16.msra.mxu1 %v763_v52 }
 0x11b   :  { %708 = vmatprep.subr.bf16.mxu1 %v906_v22 }
 0x11e   :  { %709 = vmatpush3.bf16.msra.mxu1 %v764_v53 }
 0x11f   :  { %710 = vmatprep.subr.bf16.mxu1 %v906_v22 }
 0x122   :  { %711 = vmatpush3.bf16.msra.mxu1 %v765_v54 }
 0x123   :  { %712 = vmatprep.subr.bf16.mxu1 %v906_v22 }
 0x126   :  { %713 = vmatpush3.bf16.msra.mxu1 %v766_v1 }
 0x127   :  { %714 = vmatprep.subr.bf16.mxu1 %v906_v22 }
 0x12a   :  { %715 = vmatpush3.bf16.msra.mxu1 %v767_v2 }
 0x1cd   :  { %v656_v55 = vpop.f32.mrf.mxu1 }
 0x1cf   :  { %v657_v57 = vpop.f32.mrf.mxu1 }
 0x1d0   :  { %v658_v58 = vadd.f32 %v657_v57, %v656_v55 }
 0x1d1   :  { %v659_v59 = vpop.f32.mrf.mxu1 }
 0x1d2   :  { %v349_v60 = vadd.f32 %v658_v58, %v605_v56 }
 0x1d3   :  { %v660_v61 = vpop.f32.mrf.mxu1 }
 0x1d4   :  { %vm354_vm4 = vcmp.gt.f32.partialorder %v349_v60, 0.0  ;;  %v355_v62 = vmul.f32 0.01, %v349_v60 }
 0x1d6   :  { %v356_v63 = vsel %vm354_vm4, %v349_v60, %v355_v62 }
 0x1d7   :  { %v357_v0 = vpack.c.bf16 %v356_v63, %v356_v63 }
 0x1d9   :  { %697 = vmatmul.mubr.bf16.vlgmr.msra.gmra.mxu0 %v357_v0 }
 0x299   :  { %v463_v4 = vpop.f32.mrf.mxu0 }
 0x29a   :  { %v464_v5 = vadd.f32 %v622_v3, %v463_v4 }
 0x29b   :  { %v698_v6 = vpop.f32.mrf.mxu0 }
 0x29c   :  { %vm469_vm5 = vcmp.gt.f32.partialorder %v464_v5, 0.0  ;;  %v470_v7 = vmul.f32 0.01, %v464_v5 }
 0x29d   :  { %v466_v8 = vpop.f32.mrf.mxu0 }
 0x29e   :  { %v471_v9 = vsel %vm469_vm5, %v464_v5, %v470_v7 }
 0x29f   :  { %v472_v10 = vpack.c.bf16 %v471_v9, %v471_v9  ;;  %v699_v11 = vpop.f32.mrf.mxu0 }
 0x2a1   :  { %717 = vmatmul.mubr.bf16.vlgmr.msra.gmra.mxu1 %v472_v10 }
 0x361   :  { %v578_v13 = vpop.f32.mrf.mxu1 }
 0x362   :  { %v579_v14 = vadd.f32 %v631_v12, %v578_v13 }
 0x363   :  { %v718_v15 = vpop.f32.mrf.mxu1 }
 0x364   :  { %584 = vst [vmem:[#allocation11] sm:$0xff] %v579_v14 }
 0x365   :  { %v581_v16 = vpop.f32.mrf.mxu1 }
 0x366   :  { %879 = shalt.err (!%p876_p1)
}
 0x367   :  { %594 = dma.vmem_to_hbm [thread:$0]  %s592_s19, 128, %s1025_s9, [#allocation4]   ;;  %v719_v17 = vpop.f32.mrf.mxu1 }
 0x368   :  { %894 = dma.done.wait [#allocation4], 128  }
 0x369   :  { %895 = vsyncadd [#allocation4], 4294967168 }
 0x36a   :  { %598 = vsyncpa [#allocation3], 1 }
 0x36b   :  { %599 = vsyncpa [#allocation6], 1 }
 0x36c   :  { %600 = vsyncpa [#allocation9], 1 }
 0x36d   :  { %601 = vsyncpa [#allocation4], 1 }

</bundles_post_ra>
